<compile_context>
chip_gen: v6e
topology: v6e:2x2x1
jax: 0.10.0
libtpu: 0.0.40
codegen_flags: <defaults>
</compile_context>

<pallas_src>
import math

import jax
import jax.numpy as jnp
from jax.experimental import pallas as pl
from jax.experimental.pallas import tpu as pltpu

_LANE = 128   # output slab padded to a multiple of this (lane-dense stores)
_TILE = 256   # adj row / column tile once N exceeds this


def _round_up(x, m):
    return (x + m - 1) // m * m


# ---------------------------------------------------------------------------
# Kernel 1: per row tile i, accumulate AX[i] = adj[i, :] @ x^T over column
# tiles k; at the last k apply the rank-1 layer-1 projection + relu on the
# VPU and the (block-diagonal) layer-2 weight on the MXU:
#   S2[i] = relu(AX[i] (x) W1 + b1) @ kron(I_B, W2)      -> (TM, Wout) bf16
# ---------------------------------------------------------------------------
def _project_kernel(adj_ref, xt_ref, w1_ref, b1_ref, w2_ref, s2_ref, ax_acc):
    nbatch = xt_ref.shape[1]
    k = pl.program_id(1)

    @pl.when(k == 0)
    def _():
        ax_acc[...] = jnp.zeros_like(ax_acc)

    # (TM, TK) bf16 @ (TK, B) bf16 -> f32 accumulation.
    ax_acc[...] += jnp.dot(adj_ref[...], xt_ref[...],
                           preferred_element_type=jnp.float32)

    @pl.when(k == pl.num_programs(1) - 1)
    def _():
        ax = ax_acc[...]                        # (TM, B)   f32
        w1 = w1_ref[...]                        # (1, nhid) f32
        b1 = b1_ref[...]                        # (1, nhid) f32
        # Rank-1 layer-1 projection on the VPU (no kron(I_B, W1) matmul):
        #   h[:, b*nhid + j] = relu(ax[:, b] * W1[j] + b1[j])
        parts = [jnp.maximum(ax[:, b:b + 1] * w1 + b1, 0.0)
                 for b in range(nbatch)]
        h = jnp.concatenate(parts, axis=1)      # (TM, B*nhid) f32
        # (dropout: identity in eval mode)
        w2 = w2_ref[...]                        # (B*nhid, Wout) bf16
        s2 = jnp.dot(h.astype(w2.dtype), w2,
                     preferred_element_type=jnp.float32)      # (TM, Wout)
        s2_ref[...] = s2.astype(s2_ref.dtype)


# ---------------------------------------------------------------------------
# Kernel 2: OUT[i] = sum_k adj[i, k] @ S2[k] + b2   (row tile i, col tile k)
# ---------------------------------------------------------------------------
def _aggregate_kernel(adj_ref, s2_ref, b2_ref, o_ref, acc):
    k = pl.program_id(1)

    @pl.when(k == 0)
    def _():
        acc[...] = jnp.zeros_like(acc)

    acc[...] += jnp.dot(adj_ref[...], s2_ref[...],
                        preferred_element_type=jnp.float32)

    @pl.when(k == pl.num_programs(1) - 1)
    def _():
        o_ref[...] = (acc[...] + b2_ref[...]).astype(o_ref.dtype)


@jax.jit
def gcn_forward(x, adj, w1, b1, w2, b2):
    """x: (B, N), adj: (N, N), w1: (1, nhid), b1: (nhid,), w2: (nhid, nclass),
    b2: (nclass,)  ->  (B, N, nclass) float32."""
    f32, bf16 = jnp.float32, jnp.bfloat16
    B, N = x.shape
    nhid = w1.shape[1]
    nclass = w2.shape[1]
    wout = _round_up(B * nclass, _LANE)          # lane-dense output slab width

    # --- tiling over N: rows "parallel", contraction "arbitrary" ---
    if N <= _TILE:
        tm = tk = n_pad = N                      # single tile == full array
    else:
        tm = tk = _TILE
        n_pad = _round_up(N, _TILE)              # zero-padding is exact here

    # --- operands: bf16 MXU inputs, f32 elementwise params ---
    adj_b = jnp.zeros((n_pad, n_pad), bf16).at[:N, :N].set(adj.astype(bf16))
    xt_b = jnp.zeros((n_pad, B), bf16).at[:N, :].set(x.astype(bf16).T)
    w1_row = w1.astype(f32).reshape(1, nhid)
    b1_row = b1.astype(f32).reshape(1, nhid)
    # Block-diagonal W2 (kron(I_B, W2)), zero-padded to the 128-lane slab.
    w2_kron = jnp.kron(jnp.eye(B, dtype=f32), w2.astype(f32))
    w2_blk = (jnp.zeros((B * nhid, wout), f32)
              .at[:, :B * nclass].set(w2_kron).astype(bf16))
    b2_row = (jnp.zeros((1, wout), f32)
              .at[:, :B * nclass].set(jnp.tile(b2.astype(f32), B)))

    grid = (n_pad // tm, n_pad // tk)
    cparams = pltpu.CompilerParams(
        dimension_semantics=("parallel", "arbitrary"),
        vmem_limit_bytes=64 * 1024 * 1024)

    # ---- kernel 1: S2 = relu((adj @ x^T) (x) W1 + b1) @ kron(I_B, W2) ----
    s2_slab = pl.pallas_call(
        _project_kernel,
        out_shape=jax.ShapeDtypeStruct((n_pad, wout), bf16),
        grid_spec=pltpu.PrefetchScalarGridSpec(
            num_scalar_prefetch=0,
            grid=grid,
            in_specs=[
                pl.BlockSpec((tm, tk), lambda i, k: (i, k)),          # adj
                pl.BlockSpec((tk, B), lambda i, k: (k, 0)),           # x^T
                pl.BlockSpec((1, nhid), lambda i, k: (0, 0)),         # W1
                pl.BlockSpec((1, nhid), lambda i, k: (0, 0)),         # b1
                pl.BlockSpec((B * nhid, wout), lambda i, k: (0, 0)),  # W2 blk
            ],
            out_specs=pl.BlockSpec((tm, wout), lambda i, k: (i, 0)),
            scratch_shapes=[pltpu.VMEM((tm, B), f32)],                # AX acc
        ),
        compiler_params=cparams,
    )(adj_b, xt_b, w1_row, b1_row, w2_blk)

    # ---- kernel 2: OUT = adj @ S2 + b2 ----
    out_slab = pl.pallas_call(
        _aggregate_kernel,
        out_shape=jax.ShapeDtypeStruct((n_pad, wout), f32),
        grid_spec=pltpu.PrefetchScalarGridSpec(
            num_scalar_prefetch=0,
            grid=grid,
            in_specs=[
                pl.BlockSpec((tm, tk), lambda i, k: (i, k)),          # adj
                pl.BlockSpec((tk, wout), lambda i, k: (k, 0)),        # S2
                pl.BlockSpec((1, wout), lambda i, k: (0, 0)),         # b2
            ],
            out_specs=pl.BlockSpec((tm, wout), lambda i, k: (i, 0)),
            scratch_shapes=[pltpu.VMEM((tm, wout), f32)],             # acc
        ),
        compiler_params=cparams,
    )(adj_b, s2_slab, b2_row)

    # (N_pad, Wout) lane-stacked slab -> (B, N, nclass); drop padding.
    out = out_slab[:N, :B * nclass].reshape(N, B, nclass)
    return out.transpose(1, 0, 2)


def _xavier_uniform(key, shape):
    fan_in, fan_out = shape
    limit = math.sqrt(6.0 / (fan_in + fan_out))
    return jax.random.uniform(key, shape, jnp.float32, -limit, limit)


def _reference(x, adj, w1, b1, w2, b2):
    x3 = x[:, :, None]
    s1 = jnp.einsum("bnf,fh->bnh", x3, w1)
    h = jnp.maximum(jnp.einsum("nm,bmh->bnh", adj, s1) + b1, 0.0)
    s2 = jnp.einsum("bnh,hc->bnc", h, w2)
    return jnp.einsum("nm,bmc->bnc", adj, s2) + b2


if __name__ == "__main__":
    # Small shapes consistent with the module: nfeat=1 (implied by unsqueeze(2))
    B, N = 2, 16
    nfeat, nhid, nclass = 1, 32, 8

    key = jax.random.PRNGKey(0)
    k_x, k_adj, k_w1, k_w2 = jax.random.split(key, 4)

    x = jax.random.normal(k_x, (B, N), jnp.float32)
    adj = jax.random.uniform(k_adj, (N, N), jnp.float32)
    adj = adj / jnp.sum(adj, axis=-1, keepdims=True)      # row-normalized adjacency

    # GCNLayer params: xavier_uniform_ weights, zero biases
    w1 = _xavier_uniform(k_w1, (nfeat, nhid))
    b1 = jnp.zeros((nhid,), jnp.float32)
    w2 = _xavier_uniform(k_w2, (nhid, nclass))
    b2 = jnp.zeros((nclass,), jnp.float32)

    out = gcn_forward(x, adj, w1, b1, w2, b2)
    out = jax.block_until_ready(out)

    ref = _reference(x, adj, w1, b1, w2, b2)
    assert out.shape == (B, N, nclass)
    # bf16 MXU operands with f32 accumulation vs. f32 reference -> bf16 tolerance.
    assert jnp.allclose(out, ref, atol=2e-2, rtol=2e-2), (
        float(jnp.max(jnp.abs(out - ref))))

    print("KERNEL_OK")
</pallas_src>

<mosaic_0001>
module attributes {stable_mosaic.version = 11 : i64} {
  func.func @_project_kernel(%arg0: i32, %arg1: i32, %arg2: memref<16x16xbf16, #tpu.memory_space<vmem>>, %arg3: memref<16x2xbf16, #tpu.memory_space<vmem>>, %arg4: memref<1x32xf32, #tpu.memory_space<vmem>>, %arg5: memref<1x32xf32, #tpu.memory_space<vmem>>, %arg6: memref<64x128xbf16, #tpu.memory_space<vmem>>, %arg7: memref<16x128xbf16, #tpu.memory_space<vmem>>, %arg8: memref<16x2xf32, #tpu.memory_space<vmem>>) attributes {dimension_semantics = [#tpu.dimension_semantics<parallel>, #tpu.dimension_semantics<arbitrary>], iteration_bounds = array<i64: 1, 1>, scalar_prefetch = 0 : i64, scratch_operands = 1 : i64, tpu.core_type = #tpu.core_type<tc>, window_params = [{transform_indices = @transform_0, window_bounds = array<i64: 16, 16>}, {transform_indices = @transform_1, window_bounds = array<i64: 16, 2>}, {pipeline_mode = #tpu.pipeline_mode<synchronous>, transform_indices = @transform_2, window_bounds = array<i64: 1, 32>}, {pipeline_mode = #tpu.pipeline_mode<synchronous>, transform_indices = @transform_3, window_bounds = array<i64: 1, 32>}, {pipeline_mode = #tpu.pipeline_mode<synchronous>, transform_indices = @transform_4, window_bounds = array<i64: 64, 128>}, {transform_indices = @transform_5, window_bounds = array<i64: 16, 128>}]} {
    %c0_i32 = arith.constant 0 : i32
    %0 = arith.cmpi eq, %arg1, %c0_i32 : i32
    %1 = arith.extui %0 : i1 to i32
    %c0_i32_0 = arith.constant 0 : i32
    %2 = arith.cmpi ne, %1, %c0_i32_0 : i32
    scf.if %2 {
      %cst_10 = arith.constant 0.000000e+00 : f32
      %12 = vector.broadcast %cst_10 : f32 to vector<16x2xf32>
      %c0_11 = arith.constant 0 : index
      %c0_12 = arith.constant 0 : index
      %13 = vector.load %arg8[%c0_11, %c0_12] : memref<16x2xf32, #tpu.memory_space<vmem>>, vector<16x2xf32>
      tpu.vector_store %arg8[%c0_11, %c0_12], %12 {strides = array<i32>} : memref<16x2xf32, #tpu.memory_space<vmem>>, vector<16x2xf32>,
    } else {
    }
    %c0 = arith.constant 0 : index
    %c0_1 = arith.constant 0 : index
    %3 = vector.load %arg8[%c0, %c0_1] : memref<16x2xf32, #tpu.memory_space<vmem>>, vector<16x2xf32>
    %c0_2 = arith.constant 0 : index
    %c0_3 = arith.constant 0 : index
    %4 = vector.load %arg2[%c0_2, %c0_3] : memref<16x16xbf16, #tpu.memory_space<vmem>>, vector<16x16xbf16>
    %c0_4 = arith.constant 0 : index
    %c0_5 = arith.constant 0 : index
    %5 = vector.load %arg3[%c0_4, %c0_5] : memref<16x2xbf16, #tpu.memory_space<vmem>>, vector<16x2xbf16>
    %cst = arith.constant dense<0.000000e+00> : vector<16x2xf32>
    %6 = tpu.matmul %4, %5, %cst {dimension_numbers = #tpu.dot_dimension_numbers<[1], [0], [0], [1], [0, 0, 1, 1], [], []>} : vector<16x16xbf16>, vector<16x2xbf16>, vector<16x2xf32> -> vector<16x2xf32>
    %7 = arith.addf %3, %6 : vector<16x2xf32>
    %c0_6 = arith.constant 0 : index
    %c0_7 = arith.constant 0 : index
    %8 = vector.load %arg8[%c0_6, %c0_7] : memref<16x2xf32, #tpu.memory_space<vmem>>, vector<16x2xf32>
    tpu.vector_store %arg8[%c0_6, %c0_7], %7 {strides = array<i32>} : memref<16x2xf32, #tpu.memory_space<vmem>>, vector<16x2xf32>,
    %c0_i32_8 = arith.constant 0 : i32
    %9 = arith.cmpi eq, %arg1, %c0_i32_8 : i32
    %10 = arith.extui %9 : i1 to i32
    %c0_i32_9 = arith.constant 0 : i32
    %11 = arith.cmpi ne, %10, %c0_i32_9 : i32
    scf.if %11 {
      %c0_10 = arith.constant 0 : index
      %c0_11 = arith.constant 0 : index
      %12 = vector.load %arg8[%c0_10, %c0_11] : memref<16x2xf32, #tpu.memory_space<vmem>>, vector<16x2xf32>
      %c0_12 = arith.constant 0 : index
      %c0_13 = arith.constant 0 : index
      %13 = vector.load %arg4[%c0_12, %c0_13] : memref<1x32xf32, #tpu.memory_space<vmem>>, vector<1x32xf32>
      %c0_14 = arith.constant 0 : index
      %c0_15 = arith.constant 0 : index
      %14 = vector.load %arg5[%c0_14, %c0_15] : memref<1x32xf32, #tpu.memory_space<vmem>>, vector<1x32xf32>
      %15 = vector.extract_strided_slice %12 {offsets = [0, 0], sizes = [16, 1], strides = [1, 1]} : vector<16x2xf32> to vector<16x1xf32>
      %16 = vector.broadcast %15 : vector<16x1xf32> to vector<16x32xf32>
      %17 = vector.broadcast %13 : vector<1x32xf32> to vector<16x32xf32>
      %18 = arith.mulf %16, %17 : vector<16x32xf32>
      %19 = vector.broadcast %14 : vector<1x32xf32> to vector<16x32xf32>
      %20 = arith.addf %18, %19 : vector<16x32xf32>
      %cst_16 = arith.constant 0.000000e+00 : f32
      %21 = vector.broadcast %cst_16 : f32 to vector<16x32xf32>
      %22 = arith.maximumf %20, %21 : vector<16x32xf32>
      %23 = vector.extract_strided_slice %12 {offsets = [0, 1], sizes = [16, 1], strides = [1, 1]} : vector<16x2xf32> to vector<16x1xf32>
      %24 = vector.broadcast %23 : vector<16x1xf32> to vector<16x32xf32>
      %25 = vector.broadcast %13 : vector<1x32xf32> to vector<16x32xf32>
      %26 = arith.mulf %24, %25 : vector<16x32xf32>
      %27 = vector.broadcast %14 : vector<1x32xf32> to vector<16x32xf32>
      %28 = arith.addf %26, %27 : vector<16x32xf32>
      %cst_17 = arith.constant 0.000000e+00 : f32
      %29 = vector.broadcast %cst_17 : f32 to vector<16x32xf32>
      %30 = arith.maximumf %28, %29 : vector<16x32xf32>
      %31 = tpu.concatenate %22, %30 in 1 : vector<16x32xf32>, vector<16x32xf32> -> vector<16x64xf32>
      %c0_18 = arith.constant 0 : index
      %c0_19 = arith.constant 0 : index
      %32 = vector.load %arg6[%c0_18, %c0_19] : memref<64x128xbf16, #tpu.memory_space<vmem>>, vector<64x128xbf16>
      %33 = arith.truncf %31 : vector<16x64xf32> to vector<16x64xbf16>
      %cst_20 = arith.constant dense<0.000000e+00> : vector<16x128xf32>
      %34 = tpu.matmul %33, %32, %cst_20 {dimension_numbers = #tpu.dot_dimension_numbers<[1], [0], [0], [1], [0, 0, 1, 1], [], []>} : vector<16x64xbf16>, vector<64x128xbf16>, vector<16x128xf32> -> vector<16x128xf32>
      %35 = arith.truncf %34 : vector<16x128xf32> to vector<16x128xbf16>
      %c0_21 = arith.constant 0 : index
      %c0_22 = arith.constant 0 : index
      %36 = vector.load %arg7[%c0_21, %c0_22] : memref<16x128xbf16, #tpu.memory_space<vmem>>, vector<16x128xbf16>
      tpu.vector_store %arg7[%c0_21, %c0_22], %35 {strides = array<i32>} : memref<16x128xbf16, #tpu.memory_space<vmem>>, vector<16x128xbf16>,
    } else {
    }
    return
  }
  func.func @transform_0(%arg0: i32, %arg1: i32) -> (i32, i32) {
    %c0_i32 = arith.constant 0 : i32
    return %arg0, %arg1 : i32, i32
  }
  func.func @transform_1(%arg0: i32, %arg1: i32) -> (i32, i32) {
    %c0_i32 = arith.constant 0 : i32
    %c0_i32_0 = arith.constant 0 : i32
    return %arg1, %c0_i32 : i32, i32
  }
  func.func @transform_2(%arg0: i32, %arg1: i32) -> (i32, i32) {
    %c0_i32 = arith.constant 0 : i32
    %c0_i32_0 = arith.constant 0 : i32
    %c0_i32_1 = arith.constant 0 : i32
    return %c0_i32, %c0_i32_0 : i32, i32
  }
  func.func @transform_3(%arg0: i32, %arg1: i32) -> (i32, i32) {
    %c0_i32 = arith.constant 0 : i32
    %c0_i32_0 = arith.constant 0 : i32
    %c0_i32_1 = arith.constant 0 : i32
    return %c0_i32, %c0_i32_0 : i32, i32
  }
  func.func @transform_4(%arg0: i32, %arg1: i32) -> (i32, i32) {
    %c0_i32 = arith.constant 0 : i32
    %c0_i32_0 = arith.constant 0 : i32
    %c0_i32_1 = arith.constant 0 : i32
    return %c0_i32, %c0_i32_0 : i32, i32
  }
  func.func @transform_5(%arg0: i32, %arg1: i32) -> (i32, i32) {
    %c0_i32 = arith.constant 0 : i32
    %c0_i32_0 = arith.constant 0 : i32
    return %arg0, %c0_i32 : i32, i32
  }
}

module attributes {stable_mosaic.version = 11 : i64} {
  func.func @_aggregate_kernel(%arg0: i32, %arg1: i32, %arg2: memref<16x16xbf16, #tpu.memory_space<vmem>>, %arg3: memref<16x128xbf16, #tpu.memory_space<vmem>>, %arg4: memref<1x128xf32, #tpu.memory_space<vmem>>, %arg5: memref<16x128xf32, #tpu.memory_space<vmem>>, %arg6: memref<16x128xf32, #tpu.memory_space<vmem>>) attributes {dimension_semantics = [#tpu.dimension_semantics<parallel>, #tpu.dimension_semantics<arbitrary>], iteration_bounds = array<i64: 1, 1>, scalar_prefetch = 0 : i64, scratch_operands = 1 : i64, tpu.core_type = #tpu.core_type<tc>, window_params = [{transform_indices = @transform_0, window_bounds = array<i64: 16, 16>}, {transform_indices = @transform_1, window_bounds = array<i64: 16, 128>}, {pipeline_mode = #tpu.pipeline_mode<synchronous>, transform_indices = @transform_2, window_bounds = array<i64: 1, 128>}, {transform_indices = @transform_3, window_bounds = array<i64: 16, 128>}]} {
    %c0_i32 = arith.constant 0 : i32
    %0 = arith.cmpi eq, %arg1, %c0_i32 : i32
    %1 = arith.extui %0 : i1 to i32
    %c0_i32_0 = arith.constant 0 : i32
    %2 = arith.cmpi ne, %1, %c0_i32_0 : i32
    scf.if %2 {
      %cst_10 = arith.constant 0.000000e+00 : f32
      %12 = vector.broadcast %cst_10 : f32 to vector<16x128xf32>
      %c0_11 = arith.constant 0 : index
      %c0_12 = arith.constant 0 : index
      %13 = vector.load %arg6[%c0_11, %c0_12] : memref<16x128xf32, #tpu.memory_space<vmem>>, vector<16x128xf32>
      tpu.vector_store %arg6[%c0_11, %c0_12], %12 {strides = array<i32>} : memref<16x128xf32, #tpu.memory_space<vmem>>, vector<16x128xf32>,
    } else {
    }
    %c0 = arith.constant 0 : index
    %c0_1 = arith.constant 0 : index
    %3 = vector.load %arg6[%c0, %c0_1] : memref<16x128xf32, #tpu.memory_space<vmem>>, vector<16x128xf32>
    %c0_2 = arith.constant 0 : index
    %c0_3 = arith.constant 0 : index
    %4 = vector.load %arg2[%c0_2, %c0_3] : memref<16x16xbf16, #tpu.memory_space<vmem>>, vector<16x16xbf16>
    %c0_4 = arith.constant 0 : index
    %c0_5 = arith.constant 0 : index
    %5 = vector.load %arg3[%c0_4, %c0_5] : memref<16x128xbf16, #tpu.memory_space<vmem>>, vector<16x128xbf16>
    %cst = arith.constant dense<0.000000e+00> : vector<16x128xf32>
    %6 = tpu.matmul %4, %5, %cst {dimension_numbers = #tpu.dot_dimension_numbers<[1], [0], [0], [1], [0, 0, 1, 1], [], []>} : vector<16x16xbf16>, vector<16x128xbf16>, vector<16x128xf32> -> vector<16x128xf32>
    %7 = arith.addf %3, %6 : vector<16x128xf32>
    %c0_6 = arith.constant 0 : index
    %c0_7 = arith.constant 0 : index
    %8 = vector.load %arg6[%c0_6, %c0_7] : memref<16x128xf32, #tpu.memory_space<vmem>>, vector<16x128xf32>
    tpu.vector_store %arg6[%c0_6, %c0_7], %7 {strides = array<i32>} : memref<16x128xf32, #tpu.memory_space<vmem>>, vector<16x128xf32>,
    %c0_i32_8 = arith.constant 0 : i32
    %9 = arith.cmpi eq, %arg1, %c0_i32_8 : i32
    %10 = arith.extui %9 : i1 to i32
    %c0_i32_9 = arith.constant 0 : i32
    %11 = arith.cmpi ne, %10, %c0_i32_9 : i32
    scf.if %11 {
      %c0_10 = arith.constant 0 : index
      %c0_11 = arith.constant 0 : index
      %12 = vector.load %arg6[%c0_10, %c0_11] : memref<16x128xf32, #tpu.memory_space<vmem>>, vector<16x128xf32>
      %c0_12 = arith.constant 0 : index
      %c0_13 = arith.constant 0 : index
      %13 = vector.load %arg4[%c0_12, %c0_13] : memref<1x128xf32, #tpu.memory_space<vmem>>, vector<1x128xf32>
      %14 = vector.broadcast %13 : vector<1x128xf32> to vector<16x128xf32>
      %15 = arith.addf %12, %14 : vector<16x128xf32>
      %c0_14 = arith.constant 0 : index
      %c0_15 = arith.constant 0 : index
      %16 = vector.load %arg5[%c0_14, %c0_15] : memref<16x128xf32, #tpu.memory_space<vmem>>, vector<16x128xf32>
      tpu.vector_store %arg5[%c0_14, %c0_15], %15 {strides = array<i32>} : memref<16x128xf32, #tpu.memory_space<vmem>>, vector<16x128xf32>,
    } else {
    }
    return
  }
  func.func @transform_0(%arg0: i32, %arg1: i32) -> (i32, i32) {
    %c0_i32 = arith.constant 0 : i32
    return %arg0, %arg1 : i32, i32
  }
  func.func @transform_1(%arg0: i32, %arg1: i32) -> (i32, i32) {
    %c0_i32 = arith.constant 0 : i32
    %c0_i32_0 = arith.constant 0 : i32
    return %arg1, %c0_i32 : i32, i32
  }
  func.func @transform_2(%arg0: i32, %arg1: i32) -> (i32, i32) {
    %c0_i32 = arith.constant 0 : i32
    %c0_i32_0 = arith.constant 0 : i32
    %c0_i32_1 = arith.constant 0 : i32
    return %c0_i32, %c0_i32_0 : i32, i32
  }
  func.func @transform_3(%arg0: i32, %arg1: i32) -> (i32, i32) {
    %c0_i32 = arith.constant 0 : i32
    %c0_i32_0 = arith.constant 0 : i32
    return %arg0, %c0_i32 : i32, i32
  }
}

</mosaic_0001>

<bundles_post_ra>
// kernel: gcn_forward.3
= control target key start
LH: loop header
LB: loop body
LE: loop exit
PB: predicated region body
PF: predicated region fallthrough
CT: control target
= control target key end

     0   :  { %v123_v0 = vmov 0.0   ;;  %vm124_vm0 = vmmov 0   ;;  %vm38_vm1 = vcmask 130048   ;;  %s160_s1 = inlined_call_operand.vmem [shape: bf16[16,128], index: 1, kind: input, shape index: {}]   ;;  %s161_s0 = inlined_call_operand.vmem [shape: bf16[16,16], index: 0, kind: input, shape index: {}]   ;;  %s162_s2 = inlined_call_operand.vmem [shape: f32[1,128], index: 2, kind: input, shape index: {}]   ;;  %s163_s3 = inlined_call_operand.vmem [shape: f32[16,128], index: 3, kind: output, shape index: {}]  }
   0x1   :  { %113 = vmatprep.subr.bf16.mxu0 %v123_v0  ;;  %v121_v1 = vld [vmem:[%s160_s1] sm:$0xff]   ;;  %115 = vmatprep.mubr.msk.bf16.mxu0 %vm124_vm0, %v123_v0 }
   0x2   :  { %v122_v2 = vld [vmem:[%s161_s0] sm:$0xff]   ;;  %114 = vmatpush3.bf16.msra.mxu0 %v121_v1 }
   0x3   :  { %v110_v3 = vld [vmem:[%s162_s2] ss:$0 sm:$0xff] }
   0x5   :  { %116 = vmatmul.mubr.msk.bf16.vlgmr.msra.gmra.mxu0 %vm38_vm1, %v122_v2 }
  0xc5   :  { %v76_v4 = vpop.f32.mrf.mxu0 }
  0xc6   :  { %v99_v5 = vadd.f32 %v110_v3, %v76_v4 }
  0xc7   :  { %v117_v6 = vpop.f32.mrf.mxu0 }
  0xc8   :  { %101 = vst [vmem:[%s163_s3] sm:$0xff] %v99_v5 }
  0xc9   :  { %v79_v7 = vpop.f32.mrf.mxu0 }
  0xca   :  { %v100_v8 = vadd.f32 %v110_v3, %v79_v7 }
  0xcb   :  { %v118_v9 = vpop.f32.mrf.mxu0 }
  0xcc   :  { %102 = vst [vmem:[%s163_s3 + $0x8] sm:$0xff] %v100_v8 }

// kernel: gcn_forward.2
= control target key start
LH: loop header
LB: loop body
LE: loop exit
PB: predicated region body
PF: predicated region fallthrough
CT: control target
= control target key end

     0   :  { %vm25_vm0 = vcmask 15360   ;;  %v309_v0 = vmov 0.0   ;;  %vm310_vm1 = vmmov 0   ;;  %vm45_vm2 = vcmask 130048   ;;  %s375_s1 = inlined_call_operand.vmem [shape: bf16[16,2], index: 1, kind: input, shape index: {}]   ;;  %s376_s0 = inlined_call_operand.vmem [shape: bf16[16,16], index: 0, kind: input, shape index: {}]   ;;  %s377_s4 = inlined_call_operand.vmem [shape: bf16[64,128], index: 4, kind: input, shape index: {}]   ;;  %s378_s2 = inlined_call_operand.vmem [shape: f32[1,32], index: 2, kind: input, shape index: {}]   ;;  %s379_s3 = inlined_call_operand.vmem [shape: f32[1,32], index: 3, kind: input, shape index: {}]   ;;  %s380_s5 = inlined_call_operand.vmem [shape: bf16[16,128], index: 5, kind: output, shape index: {}]  }
   0x1   :  { %273 = vmatprep.subr.bf16.mxu0 %v309_v0  ;;  %v303_v1 = vld [vmem:[%s375_s1] sm:$0xff]   ;;  %275 = vmatprep.mubr.msk.bf16.mxu0 %vm310_vm1, %v309_v0  ;;  %26 = vst.msk [vmem:[#allocation2] sm:$0xff] %vm25_vm0, %v309_v0  ;;  %27 = vst.msk [vmem:[#allocation2 + $0x8] sm:$0xff] %vm25_vm0, %v309_v0  ;;  %v311_v3 = vmov 1   ;;  %v312_v4 = vmov 0   ;;  %v305_v15 = vld [vmem:[%s377_s4 + $0x18] sm:$0xff]  }
   0x2   :  { %v304_v2 = vld [vmem:[%s376_s0] sm:$0xff]   ;;  %279 = vmatprep.subr.bf16.mxu1 %v309_v0  ;;  %287 = vmatprep.mubr.msk.bf16.mxu1 %vm310_vm1, %v309_v0  ;;  %v306_v16 = vld [vmem:[%s377_s4 + $0x10] sm:$0xff]   ;;  %v307_v17 = vld [vmem:[%s377_s4 + $0x8] sm:$0xff]   ;;  %vm152_vm3 = vcmask 261120   ;;  %vm188_vm4 = vcmask 523264  }
   0x3   :  { %274 = vmatpush3.bf16.msra.mxu0 %v303_v1  ;;  %296 = vset.pattern.permute.xlu0 %v311_v3  ;;  %v250_v18 = vld [vmem:[%s378_s2] ss:$0 sm:$0xff]  ;;  %s313_s2 = smov 32  }
   0x4   :  { %297 = vset.pattern.permute.xlu1 %v312_v4  ;;  %280 = vmatpush3.bf16.msra.mxu1 %v305_v15  ;;  %v251_v19 = vld [vmem:[%s379_s3] ss:$0 sm:$0xff] }
   0x5   :  { %281 = vmatprep.subr.bf16.mxu1 %v309_v0  ;;  %v308_v22 = vld [vmem:[%s377_s4] sm:$0xff]  }
   0x6   :  { %276 = vmatmul.mubr.msk.bf16.vlgmr.msra.gmra.mxu0 %vm45_vm2, %v304_v2 }
   0x8   :  { %v28_v5 = vld [vmem:[#allocation2] sm:$0xff]  ;;  %v29_v9 = vld [vmem:[#allocation2 + $0x8] sm:$0xff]  ;;  %282 = vmatpush3.bf16.msra.mxu1 %v306_v16 }
   0x9   :  { %283 = vmatprep.subr.bf16.mxu1 %v309_v0 }
   0xc   :  { %284 = vmatpush3.bf16.msra.mxu1 %v307_v17 }
   0xd   :  { %285 = vmatprep.subr.bf16.mxu1 %v309_v0 }
  0x10   :  { %286 = vmatpush3.bf16.msra.mxu1 %v308_v22 }
  0xc6   :  { %v83_v6 = vpop.f32.mrf.mxu0 }
  0xc7   :  { %v90_v7 = vadd.f32 %v83_v6, %v28_v5 }
  0xc8   :  { %v277_v8 = vpop.f32.mrf.mxu0 }
  0xc9   :  { %93 = vst.msk [vmem:[#allocation2] sm:$0xff] %vm25_vm0, %v90_v7 }
  0xca   :  { %v86_v10 = vpop.f32.mrf.mxu0 }
  0xcb   :  { %v91_v11 = vadd.f32 %v86_v10, %v29_v9 }
  0xcc   :  { %v278_v12 = vpop.f32.mrf.mxu0 }
  0xcd   :  { %94 = vst.msk [vmem:[#allocation2 + $0x8] sm:$0xff] %vm25_vm0, %v91_v11 }
  0xd0   :  { %v98_v13 = vld [vmem:[#allocation2] sm:$0xff] }
  0xd1   :  { %104 = vperm.xlu1 %297, %v98_v13   ;;  %131 = vperm.xlu0 %296, %v98_v13  }
  0xd4   :  { %v99_v14 = vld [vmem:[#allocation2 + $0x8] sm:$0xff] }
  0xd5   :  { %109 = vperm.xlu1 %297, %v99_v14   ;;  %135 = vperm.xlu0 %296, %v99_v14  }
 0x14c   :  { %v105_v20 = vpop.permute.xlu1 %104  ;;  %v132_v21 = vpop.permute.xlu0 %131 }
 0x14d   :  { %v118_v23 = vmul.f32 %v250_v18, %v105_v20  ;;  %v138_v24 = vmul.f32 %v250_v18, %v132_v21 }
 0x14f   :  { %v126_v25 = vadd.f32 %v251_v19, %v118_v23  ;;  %v140_v28 = vadd.f32 %v251_v19, %v138_v24 }
 0x150   :  { %v110_v26 = vpop.permute.xlu1 %109  ;;  %v136_v27 = vpop.permute.xlu0 %135 }
 0x151   :  { %v119_v29 = vmul.f32 %v250_v18, %v110_v26  ;;  %v139_v30 = vmul.f32 %v250_v18, %v136_v27  ;;  %v142_v33 = vmax.f32 %v140_v28, 0.0  ;;  %v128_v37 = vmax.f32 %v126_v25, 0.0 }
 0x153   :  { %v127_v31 = vadd.f32 %v251_v19, %v119_v29  ;;  %v141_v32 = vadd.f32 %v251_v19, %v139_v30 }
 0x155   :  { %v143_v34 = vmax.f32 %v141_v32, 0.0  ;;  %v129_v38 = vmax.f32 %v127_v31, 0.0 }
 0x157   :  { %v298_v35 = vpack.i.bf16 %v143_v34, %v142_v33 }
 0x159   :  { %299 = vrot.lane.b32.xlu0 %v298_v35, %s313_s2 }
 0x1cb   :  { %v300_v36 = vpop.permute.xlu0 %299 }
 0x1cc   :  { %v302_v39 = vunpack.i.h.bf16 %v300_v36  ;;  %v301_v40 = vunpack.i.l.bf16 %v300_v36 }
 0x1ce   :  { %v154_v41 = vsel %vm152_vm3, %v129_v38, %v302_v39  ;;  %v153_v42 = vsel %vm152_vm3, %v128_v37, %v301_v40 }
 0x1cf   :  { %v163_v43 = vpack.c.bf16 %v154_v41, %v153_v42 }
 0x1d1   :  { %288 = vmatmul.mubr.msk.bf16.vlgmr.msra.gmra.mxu1 %vm188_vm4, %v163_v43 }
 0x291   :  { %v226_v44 = vpop.f32.mrf.mxu1 }
 0x293   :  { %v289_v45 = vpop.f32.mrf.mxu1 }
 0x295   :  { %v229_v46 = vpop.f32.mrf.mxu1 }
 0x296   :  { %v264_v47 = vpack.c.bf16 %v229_v46, %v226_v44 }
 0x297   :  { %v290_v48 = vpop.f32.mrf.mxu1 }
 0x298   :  { %265 = vst [vmem:[%s380_s5] sm:$0xff] %v264_v47  }

</bundles_post_ra>
